<compile_context>
chip_gen: v5e
topology: v5e:2x2
jax: 0.10.0
libtpu: 0.0.40
codegen_flags: <defaults>
</compile_context>

<pallas_src>
import functools

import jax
import jax.numpy as jnp
from jax.experimental import pallas as pl
from jax.experimental.pallas import tpu as pltpu


# ----------------------------------------------------------------------------
# Fused kernel: 1x1 conv (input_proj) + curve sampling -> ROI boxes + validity
# Grid = (N,) over batch, "parallel" so it shards across TCs where available.
# ----------------------------------------------------------------------------
def _make_fused_kernel(img_h, img_w, r):
    def kernel(x_ref, w_ref, b_ref, coef_ref, y_ref,
               proj_ref, imgc_ref, valid_ref):
        # ---- input_proj: 1x1 conv == channel matmul, NCHW kept native ----
        # x_ref: (1, C_in, HW)  w_ref: (C_out, C_in)  b_ref: (C_out, 1)
        acc = jnp.dot(w_ref[...], x_ref[0],
                      preferred_element_type=jnp.float32)     # (C_out, HW)
        proj_ref[0] = (acc + b_ref[...]).astype(proj_ref.dtype)

        # ---- curve sampling / ROI boxes (get_latest_input_bbox, qi==0) ----
        # coef_ref: (1, 4, QS) rows = b0,b1,b2,b3 pre-expanded per sample step
        # y_ref:    (1, QS)    normalized sample ys tiled per query
        y = y_ref[...]                                         # (1, QS)
        b0 = coef_ref[0, 0:1, :]
        b1 = coef_ref[0, 1:2, :]
        b2 = coef_ref[0, 2:3, :]
        b3 = coef_ref[0, 3:4, :]
        xs = ((b3 * y + b2) * y + b1) * y + b0                 # Horner
        xs_p = xs * img_w                                      # (1, QS)
        ys_p = y * img_h                                       # (1, QS)

        # Batch-id channel: this grid step's batch index (no integer divide).
        bid = jnp.broadcast_to(pl.program_id(0).astype(jnp.float32),
                               xs_p.shape)

        # Lane-dense (128-wide) row stores.
        imgc_ref[0, 0:1, :] = bid                              # batch index
        imgc_ref[0, 1:2, :] = xs_p - r                         # x1
        imgc_ref[0, 2:3, :] = ys_p - r                         # y1
        imgc_ref[0, 3:4, :] = xs_p + r                         # x2
        imgc_ref[0, 4:5, :] = ys_p + r                         # y2

        # centerx == xs_p, centery == ys_p (midpoints of the +-r box).
        valid = (xs_p > 0.0) & (xs_p < img_w) & (ys_p >= 0.0) & (ys_p < img_h)
        valid_ref[0] = valid.astype(jnp.int32)

    return kernel


def detector_forward(fea1, pred_curves, w_proj, b_proj, *,
                     steps, img_h, img_w, roi_r):
    """fea1: (N, 128, H, W) NCHW;  pred_curves: (N, Q, 4) = [b0,b1,b2,b3]."""
    N, C_in, H, W = fea1.shape
    C_out = w_proj.shape[0]
    HW = H * W
    B, Q, _ = pred_curves.shape
    assert B == N
    QS = Q * steps

    # NCHW stays NCHW: merging H,W is a free view, no transpose round-trip.
    x3 = fea1.reshape(N, C_in, HW)

    # Lane-friendly coefficient layout: coef[n, k, q*steps+s] = curves[n, q, k]
    coef = jnp.repeat(
        jnp.transpose(pred_curves.astype(jnp.float32), (0, 2, 1)),
        steps, axis=2)                                          # (N, 4, QS)
    # y_tile[0, q*steps+s] = tgt_y[s]  (static; constant-folded under jit)
    tgt_y = jnp.linspace(0.0, 0.998, steps, dtype=jnp.float32)
    y_tile = jnp.tile(tgt_y, Q).reshape(1, QS)

    kernel = _make_fused_kernel(float(img_h), float(img_w), float(roi_r))

    proj3, imgc, valid_i = pl.pallas_call(
        kernel,
        out_shape=(
            jax.ShapeDtypeStruct((N, C_out, HW), fea1.dtype),
            jax.ShapeDtypeStruct((N, 5, QS), jnp.float32),
            jax.ShapeDtypeStruct((N, 1, QS), jnp.int32),
        ),
        grid_spec=pltpu.PrefetchScalarGridSpec(
            num_scalar_prefetch=0,
            grid=(N,),
            in_specs=[
                pl.BlockSpec((1, C_in, HW), lambda n: (n, 0, 0)),
                pl.BlockSpec((C_out, C_in), lambda n: (0, 0)),
                pl.BlockSpec((C_out, 1), lambda n: (0, 0)),
                pl.BlockSpec((1, 4, QS), lambda n: (n, 0, 0)),
                pl.BlockSpec((1, QS), lambda n: (0, 0)),
            ],
            out_specs=[
                pl.BlockSpec((1, C_out, HW), lambda n: (n, 0, 0)),
                pl.BlockSpec((1, 5, QS), lambda n: (n, 0, 0)),
                pl.BlockSpec((1, 1, QS), lambda n: (n, 0, 0)),
            ],
        ),
        compiler_params=pltpu.CompilerParams(
            dimension_semantics=("parallel",)),
    )(x3, w_proj, b_proj.reshape(C_out, 1), coef, y_tile)

    proj = proj3.reshape(N, C_out, H, W)                        # NCHW output
    imgC = jnp.transpose(imgc, (0, 2, 1)).reshape(B, Q, steps, 5)
    valid = valid_i.reshape(B, Q, steps) != 0
    return proj, imgC, valid


if __name__ == "__main__":
    key = jax.random.PRNGKey(0)
    k1, k2, k3, k4, k5 = jax.random.split(key, 5)

    # Small shapes consistent with the module (input_proj requires C_in=128).
    N, C_in, H, W = 2, 128, 16, 16      # backbone fea[-1]; HW=256 lane-dense
    hidden_dim = 32                     # cfg.positional_encoding['num_pos_feats']
    num_queries = 8                     # cfg.num_queries
    steps = 16                          # cfg.sampling_steps (Q*steps = 128)
    img_h, img_w, roi_r = 320.0, 800.0, 4.0

    fea1 = jax.random.normal(k1, (N, C_in, H, W), dtype=jnp.float32)
    # nn.Conv2d(128, hidden_dim, 1): weight (C_out, C_in), bias (C_out,)
    w_proj = jax.random.normal(k2, (hidden_dim, C_in), jnp.float32) * 0.02
    b_proj = jax.random.normal(k3, (hidden_dim,), jnp.float32) * 0.02
    # nn.Embedding(num_queries, hidden_dim).weight (consumed by the external
    # transformer, which is not defined in this module).
    query_embed = jax.random.normal(k4, (num_queries, hidden_dim), jnp.float32)
    # Stand-in for cam_outputs['pred_curves'] (B, Q, 4): [b0, b1, b2, b3].
    pred_curves = jax.random.uniform(k5, (N, num_queries, 4), jnp.float32)

    fwd = jax.jit(functools.partial(
        detector_forward, steps=steps, img_h=img_h, img_w=img_w, roi_r=roi_r))
    proj, imgC, valid = fwd(fea1, pred_curves, w_proj, b_proj)
    jax.block_until_ready((proj, imgC, valid))

    # ---- light sanity checks against plain-JAX references ----
    ref_proj = (jnp.einsum("oc,ncp->nop", w_proj,
                           fea1.reshape(N, C_in, H * W))
                + b_proj[None, :, None]).reshape(N, hidden_dim, H, W)
    assert jnp.allclose(proj, ref_proj, atol=2e-3, rtol=2e-3)

    y = jnp.linspace(0.0, 0.998, steps, dtype=jnp.float32)
    b0, b1, b2, b3 = [pred_curves[..., i][..., None] for i in range(4)]
    xs_ref = (b3 * y ** 3 + b2 * y ** 2 + b1 * y + b0) * img_w  # expanded form
    ys_ref = jnp.broadcast_to(y * img_h, xs_ref.shape)
    assert jnp.allclose(imgC[..., 1], xs_ref - roi_r, atol=5e-3, rtol=1e-4)
    assert jnp.allclose(imgC[..., 3], xs_ref + roi_r, atol=5e-3, rtol=1e-4)
    assert jnp.allclose(imgC[..., 2], ys_ref - roi_r, atol=1e-3)
    assert jnp.allclose(imgC[..., 4], ys_ref + roi_r, atol=1e-3)

    bid_ref = jnp.broadcast_to(
        jnp.arange(N, dtype=jnp.float32)[:, None, None],
        (N, num_queries, steps))
    assert jnp.array_equal(imgC[..., 0], bid_ref)

    # Validity reference uses the same Horner fp ordering as the kernel so the
    # boolean comparison is exact.
    xs_h = (((b3 * y + b2) * y + b1) * y + b0) * img_w
    valid_ref = (xs_h > 0) & (xs_h < img_w) & (ys_ref >= 0) & (ys_ref < img_h)
    assert jnp.array_equal(valid, valid_ref)

    print("KERNEL_OK")
</pallas_src>

<mosaic_0001>
module attributes {stable_mosaic.version = 11 : i64} {
  func.func @kernel(%arg0: i32, %arg1: memref<1x128x256xf32, #tpu.memory_space<vmem>>, %arg2: memref<32x128xf32, #tpu.memory_space<vmem>>, %arg3: memref<32x1xf32, #tpu.memory_space<vmem>>, %arg4: memref<1x4x128xf32, #tpu.memory_space<vmem>>, %arg5: memref<1x128xf32, #tpu.memory_space<vmem>>, %arg6: memref<1x32x256xf32, #tpu.memory_space<vmem>>, %arg7: memref<1x5x128xf32, #tpu.memory_space<vmem>>, %arg8: memref<1x1x128xi32, #tpu.memory_space<vmem>>) attributes {dimension_semantics = [#tpu.dimension_semantics<parallel>], iteration_bounds = array<i64: 2>, scalar_prefetch = 0 : i64, scratch_operands = 0 : i64, tpu.core_type = #tpu.core_type<tc>, window_params = [{transform_indices = @transform_0, window_bounds = array<i64: 1, 128, 256>}, {pipeline_mode = #tpu.pipeline_mode<synchronous>, transform_indices = @transform_1, window_bounds = array<i64: 32, 128>}, {pipeline_mode = #tpu.pipeline_mode<synchronous>, transform_indices = @transform_2, window_bounds = array<i64: 32, 1>}, {transform_indices = @transform_3, window_bounds = array<i64: 1, 4, 128>}, {pipeline_mode = #tpu.pipeline_mode<synchronous>, transform_indices = @transform_4, window_bounds = array<i64: 1, 128>}, {transform_indices = @transform_5, window_bounds = array<i64: 1, 32, 256>}, {transform_indices = @transform_6, window_bounds = array<i64: 1, 5, 128>}, {transform_indices = @transform_7, window_bounds = array<i64: 1, 1, 128>}]} {
    %c0 = arith.constant 0 : index
    %c0_0 = arith.constant 0 : index
    %0 = vector.load %arg2[%c0, %c0_0] : memref<32x128xf32, #tpu.memory_space<vmem>>, vector<32x128xf32>
    %c0_1 = arith.constant 0 : index
    %c0_2 = arith.constant 0 : index
    %c0_3 = arith.constant 0 : index
    %1 = vector.load %arg1[%c0_1, %c0_2, %c0_3] : memref<1x128x256xf32, #tpu.memory_space<vmem>>, vector<1x128x256xf32>
    %2 = vector.shape_cast %1 : vector<1x128x256xf32> to vector<128x256xf32>
    %cst = arith.constant dense<0.000000e+00> : vector<32x256xf32>
    %3 = tpu.matmul %0, %2, %cst {dimension_numbers = #tpu.dot_dimension_numbers<[1], [0], [0], [1], [0, 0, 1, 1], [], []>} : vector<32x128xf32>, vector<128x256xf32>, vector<32x256xf32> -> vector<32x256xf32>
    %c0_4 = arith.constant 0 : index
    %c0_5 = arith.constant 0 : index
    %4 = vector.load %arg3[%c0_4, %c0_5] : memref<32x1xf32, #tpu.memory_space<vmem>>, vector<32x1xf32>
    %5 = vector.broadcast %4 : vector<32x1xf32> to vector<32x256xf32>
    %6 = arith.addf %3, %5 : vector<32x256xf32>
    %c0_6 = arith.constant 0 : index
    %c0_7 = arith.constant 0 : index
    %c0_8 = arith.constant 0 : index
    %7 = vector.load %arg6[%c0_6, %c0_7, %c0_8] : memref<1x32x256xf32, #tpu.memory_space<vmem>>, vector<1x32x256xf32>
    %8 = vector.shape_cast %7 : vector<1x32x256xf32> to vector<32x256xf32>
    %9 = vector.shape_cast %6 : vector<32x256xf32> to vector<1x32x256xf32>
    tpu.vector_store %arg6[%c0_6, %c0_7, %c0_8], %9 {strides = array<i32>} : memref<1x32x256xf32, #tpu.memory_space<vmem>>, vector<1x32x256xf32>,
    %c0_9 = arith.constant 0 : index
    %c0_10 = arith.constant 0 : index
    %10 = vector.load %arg5[%c0_9, %c0_10] : memref<1x128xf32, #tpu.memory_space<vmem>>, vector<1x128xf32>
    %c0_11 = arith.constant 0 : index
    %c0_12 = arith.constant 0 : index
    %c0_13 = arith.constant 0 : index
    %11 = vector.load %arg4[%c0_11, %c0_12, %c0_13] : memref<1x4x128xf32, #tpu.memory_space<vmem>>, vector<1x1x128xf32>
    %12 = vector.shape_cast %11 : vector<1x1x128xf32> to vector<1x128xf32>
    %c0_14 = arith.constant 0 : index
    %c1 = arith.constant 1 : index
    %c0_15 = arith.constant 0 : index
    %13 = vector.load %arg4[%c0_14, %c1, %c0_15] : memref<1x4x128xf32, #tpu.memory_space<vmem>>, vector<1x1x128xf32>
    %14 = vector.shape_cast %13 : vector<1x1x128xf32> to vector<1x128xf32>
    %c0_16 = arith.constant 0 : index
    %c2 = arith.constant 2 : index
    %c0_17 = arith.constant 0 : index
    %15 = vector.load %arg4[%c0_16, %c2, %c0_17] : memref<1x4x128xf32, #tpu.memory_space<vmem>>, vector<1x1x128xf32>
    %16 = vector.shape_cast %15 : vector<1x1x128xf32> to vector<1x128xf32>
    %c0_18 = arith.constant 0 : index
    %c3 = arith.constant 3 : index
    %c0_19 = arith.constant 0 : index
    %17 = vector.load %arg4[%c0_18, %c3, %c0_19] : memref<1x4x128xf32, #tpu.memory_space<vmem>>, vector<1x1x128xf32>
    %18 = vector.shape_cast %17 : vector<1x1x128xf32> to vector<1x128xf32>
    %19 = arith.mulf %18, %10 : vector<1x128xf32>
    %20 = arith.addf %19, %16 : vector<1x128xf32>
    %21 = arith.mulf %20, %10 : vector<1x128xf32>
    %22 = arith.addf %21, %14 : vector<1x128xf32>
    %23 = arith.mulf %22, %10 : vector<1x128xf32>
    %24 = arith.addf %23, %12 : vector<1x128xf32>
    %cst_20 = arith.constant 8.000000e+02 : f32
    %25 = vector.broadcast %cst_20 : f32 to vector<1x128xf32>
    %26 = arith.mulf %24, %25 : vector<1x128xf32>
    %cst_21 = arith.constant 3.200000e+02 : f32
    %27 = vector.broadcast %cst_21 : f32 to vector<1x128xf32>
    %28 = arith.mulf %10, %27 : vector<1x128xf32>
    %29 = arith.sitofp %arg0 : i32 to f32
    %30 = vector.broadcast %29 : f32 to vector<1x128xf32>
    %c0_22 = arith.constant 0 : index
    %c0_23 = arith.constant 0 : index
    %c0_24 = arith.constant 0 : index
    %31 = vector.load %arg7[%c0_22, %c0_23, %c0_24] : memref<1x5x128xf32, #tpu.memory_space<vmem>>, vector<1x1x128xf32>
    %32 = vector.shape_cast %31 : vector<1x1x128xf32> to vector<1x128xf32>
    %33 = vector.shape_cast %30 : vector<1x128xf32> to vector<1x1x128xf32>
    tpu.vector_store %arg7[%c0_22, %c0_23, %c0_24], %33 {strides = array<i32>} : memref<1x5x128xf32, #tpu.memory_space<vmem>>, vector<1x1x128xf32>,
    %cst_25 = arith.constant 4.000000e+00 : f32
    %34 = vector.broadcast %cst_25 : f32 to vector<1x128xf32>
    %35 = arith.subf %26, %34 : vector<1x128xf32>
    %c0_26 = arith.constant 0 : index
    %c1_27 = arith.constant 1 : index
    %c0_28 = arith.constant 0 : index
    %36 = vector.load %arg7[%c0_26, %c1_27, %c0_28] : memref<1x5x128xf32, #tpu.memory_space<vmem>>, vector<1x1x128xf32>
    %37 = vector.shape_cast %36 : vector<1x1x128xf32> to vector<1x128xf32>
    %38 = vector.shape_cast %35 : vector<1x128xf32> to vector<1x1x128xf32>
    tpu.vector_store %arg7[%c0_26, %c1_27, %c0_28], %38 {strides = array<i32>} : memref<1x5x128xf32, #tpu.memory_space<vmem>>, vector<1x1x128xf32>,
    %cst_29 = arith.constant 4.000000e+00 : f32
    %39 = vector.broadcast %cst_29 : f32 to vector<1x128xf32>
    %40 = arith.subf %28, %39 : vector<1x128xf32>
    %c0_30 = arith.constant 0 : index
    %c2_31 = arith.constant 2 : index
    %c0_32 = arith.constant 0 : index
    %41 = vector.load %arg7[%c0_30, %c2_31, %c0_32] : memref<1x5x128xf32, #tpu.memory_space<vmem>>, vector<1x1x128xf32>
    %42 = vector.shape_cast %41 : vector<1x1x128xf32> to vector<1x128xf32>
    %43 = vector.shape_cast %40 : vector<1x128xf32> to vector<1x1x128xf32>
    tpu.vector_store %arg7[%c0_30, %c2_31, %c0_32], %43 {strides = array<i32>} : memref<1x5x128xf32, #tpu.memory_space<vmem>>, vector<1x1x128xf32>,
    %cst_33 = arith.constant 4.000000e+00 : f32
    %44 = vector.broadcast %cst_33 : f32 to vector<1x128xf32>
    %45 = arith.addf %26, %44 : vector<1x128xf32>
    %c0_34 = arith.constant 0 : index
    %c3_35 = arith.constant 3 : index
    %c0_36 = arith.constant 0 : index
    %46 = vector.load %arg7[%c0_34, %c3_35, %c0_36] : memref<1x5x128xf32, #tpu.memory_space<vmem>>, vector<1x1x128xf32>
    %47 = vector.shape_cast %46 : vector<1x1x128xf32> to vector<1x128xf32>
    %48 = vector.shape_cast %45 : vector<1x128xf32> to vector<1x1x128xf32>
    tpu.vector_store %arg7[%c0_34, %c3_35, %c0_36], %48 {strides = array<i32>} : memref<1x5x128xf32, #tpu.memory_space<vmem>>, vector<1x1x128xf32>,
    %cst_37 = arith.constant 4.000000e+00 : f32
    %49 = vector.broadcast %cst_37 : f32 to vector<1x128xf32>
    %50 = arith.addf %28, %49 : vector<1x128xf32>
    %c0_38 = arith.constant 0 : index
    %c4 = arith.constant 4 : index
    %c0_39 = arith.constant 0 : index
    %51 = vector.load %arg7[%c0_38, %c4, %c0_39] : memref<1x5x128xf32, #tpu.memory_space<vmem>>, vector<1x1x128xf32>
    %52 = vector.shape_cast %51 : vector<1x1x128xf32> to vector<1x128xf32>
    %53 = vector.shape_cast %50 : vector<1x128xf32> to vector<1x1x128xf32>
    tpu.vector_store %arg7[%c0_38, %c4, %c0_39], %53 {strides = array<i32>} : memref<1x5x128xf32, #tpu.memory_space<vmem>>, vector<1x1x128xf32>,
    %cst_40 = arith.constant 0.000000e+00 : f32
    %54 = vector.broadcast %cst_40 : f32 to vector<1x128xf32>
    %55 = arith.cmpf ogt, %26, %54 : vector<1x128xf32>
    %cst_41 = arith.constant 8.000000e+02 : f32
    %56 = vector.broadcast %cst_41 : f32 to vector<1x128xf32>
    %57 = arith.cmpf olt, %26, %56 : vector<1x128xf32>
    %58 = arith.andi %55, %57 : vector<1x128xi1>
    %cst_42 = arith.constant 0.000000e+00 : f32
    %59 = vector.broadcast %cst_42 : f32 to vector<1x128xf32>
    %60 = arith.cmpf oge, %28, %59 : vector<1x128xf32>
    %61 = arith.andi %58, %60 : vector<1x128xi1>
    %cst_43 = arith.constant 3.200000e+02 : f32
    %62 = vector.broadcast %cst_43 : f32 to vector<1x128xf32>
    %63 = arith.cmpf olt, %28, %62 : vector<1x128xf32>
    %64 = arith.andi %61, %63 : vector<1x128xi1>
    %65 = arith.extui %64 : vector<1x128xi1> to vector<1x128xi32>
    %c0_44 = arith.constant 0 : index
    %c0_45 = arith.constant 0 : index
    %c0_46 = arith.constant 0 : index
    %66 = vector.load %arg8[%c0_44, %c0_45, %c0_46] : memref<1x1x128xi32, #tpu.memory_space<vmem>>, vector<1x1x128xi32>
    %67 = vector.shape_cast %66 : vector<1x1x128xi32> to vector<1x128xi32>
    %68 = vector.shape_cast %65 : vector<1x128xi32> to vector<1x1x128xi32>
    tpu.vector_store %arg8[%c0_44, %c0_45, %c0_46], %68 {strides = array<i32>} : memref<1x1x128xi32, #tpu.memory_space<vmem>>, vector<1x1x128xi32>,
    return
  }
  func.func @transform_0(%arg0: i32) -> (i32, i32, i32) {
    %c0_i32 = arith.constant 0 : i32
    %c0_i32_0 = arith.constant 0 : i32
    %c0_i32_1 = arith.constant 0 : i32
    return %arg0, %c0_i32, %c0_i32_0 : i32, i32, i32
  }
  func.func @transform_1(%arg0: i32) -> (i32, i32) {
    %c0_i32 = arith.constant 0 : i32
    %c0_i32_0 = arith.constant 0 : i32
    %c0_i32_1 = arith.constant 0 : i32
    return %c0_i32, %c0_i32_0 : i32, i32
  }
  func.func @transform_2(%arg0: i32) -> (i32, i32) {
    %c0_i32 = arith.constant 0 : i32
    %c0_i32_0 = arith.constant 0 : i32
    %c0_i32_1 = arith.constant 0 : i32
    return %c0_i32, %c0_i32_0 : i32, i32
  }
  func.func @transform_3(%arg0: i32) -> (i32, i32, i32) {
    %c0_i32 = arith.constant 0 : i32
    %c0_i32_0 = arith.constant 0 : i32
    %c0_i32_1 = arith.constant 0 : i32
    return %arg0, %c0_i32, %c0_i32_0 : i32, i32, i32
  }
  func.func @transform_4(%arg0: i32) -> (i32, i32) {
    %c0_i32 = arith.constant 0 : i32
    %c0_i32_0 = arith.constant 0 : i32
    %c0_i32_1 = arith.constant 0 : i32
    return %c0_i32, %c0_i32_0 : i32, i32
  }
  func.func @transform_5(%arg0: i32) -> (i32, i32, i32) {
    %c0_i32 = arith.constant 0 : i32
    %c0_i32_0 = arith.constant 0 : i32
    %c0_i32_1 = arith.constant 0 : i32
    return %arg0, %c0_i32, %c0_i32_0 : i32, i32, i32
  }
  func.func @transform_6(%arg0: i32) -> (i32, i32, i32) {
    %c0_i32 = arith.constant 0 : i32
    %c0_i32_0 = arith.constant 0 : i32
    %c0_i32_1 = arith.constant 0 : i32
    return %arg0, %c0_i32, %c0_i32_0 : i32, i32, i32
  }
  func.func @transform_7(%arg0: i32) -> (i32, i32, i32) {
    %c0_i32 = arith.constant 0 : i32
    %c0_i32_0 = arith.constant 0 : i32
    %c0_i32_1 = arith.constant 0 : i32
    return %arg0, %c0_i32, %c0_i32_0 : i32, i32, i32
  }
}

</mosaic_0001>

<bundles_post_ra>
// kernel: tile.8
= control target key start
LH: loop header
LB: loop body
LE: loop exit
PB: predicated region body
PF: predicated region fallthrough
CT: control target
= control target key end

     0   :  { %s22_s0 = inlined_call_operand.vmem [shape: f32[16], index: 0, kind: input, shape index: {}]   ;;  %s23_s1 = inlined_call_operand.vmem [shape: f32[8,16], index: 1, kind: output, shape index: {}]  }
   0x1   :  { %v4_v0 = vld [vmem:[%s22_s0] ss:$0 sm:$0xff] }
   0x2   :  { %5 = vst [vmem:[%s23_s1] sm:$0xff] %v4_v0 }

// kernel: tile.9
= control target key start
LH: loop header
LB: loop body
LE: loop exit
PB: predicated region body
PF: predicated region fallthrough
CT: control target
= control target key end

     0   :  { %s67_s10 = smov 112   ;;  %s68_s11 = smov 80   ;;  %vm3_vm0 = vcmask 130048   ;;  %vm9_vm1 = vcmask 1048448   ;;  %vm15_vm2 = vcmask 917248   ;;  %vm21_vm3 = vcmask 786048   ;;  %s111_s0 = inlined_call_operand.vmem [shape: f32[8,16], index: 0, kind: input, shape index: {}]   ;;  %s112_s1 = inlined_call_operand.vmem [shape: f32[1,128], index: 1, kind: output, shape index: {}]  }
   0x1   :  { %v53_v0 = vld [vmem:[%s111_s0 + $0x7] sm:$0x1]   ;;  %v55_v1 = vld [vmem:[%s111_s0 + $0x5] sm:$0x1]   ;;  %v57_v2 = vld [vmem:[%s111_s0 + $0x3] sm:$0x1]  }
   0x2   :  { %7 = vrot.lane.b32.xlu0 %v53_v0, %s67_s10  ;;  %19 = vrot.lane.b32.xlu1 %v55_v1, %s68_s11  ;;  %s69_s14 = smov 48   ;;  %v54_v3 = vld [vmem:[%s111_s0 + $0x6] sm:$0x1]   ;;  %v56_v4 = vld [vmem:[%s111_s0 + $0x4] sm:$0x1]   ;;  %s70_s21 = smov 96  }
   0x3   :  { %31 = vrot.lane.b32.xlu2 %v57_v2, %s69_s14  ;;  %v58_v5 = vld [vmem:[%s111_s0 + $0x2] sm:$0x1]   ;;  %s71_s22 = smov 64   ;;  %s72_s23 = smov 32   ;;  %v59_v6 = vld [vmem:[%s111_s0 + $0x1] sm:$0x1]  }
   0x4   :  { %s73_s26 = smov 16   ;;  %v2_v7 = vld [vmem:[%s111_s0] sm:$0x1]   ;;  %vm27_vm4 = vcmask 654848   ;;  %vm33_vm5 = vcmask 523648   ;;  %vm39_vm6 = vcmask 392448  }
   0x5   :  { %4 = vst.msk [vmem:[#allocation0] sm:$0x1] %vm3_vm0, %v2_v7   ;;  %vm45_vm7 = vcmask 261248  }
   0xa   :  { %13 = vrot.lane.b32.xlu0 %v54_v3, %s70_s21  ;;  %25 = vrot.lane.b32.xlu1 %v56_v4, %s71_s22 }
   0xb   :  { %37 = vrot.lane.b32.xlu2 %v58_v5, %s72_s23 }
  0x12   :  { %43 = vrot.lane.b32.xlu0 %v59_v6, %s73_s26 }
  0x5d   :  { %v32_v8 = vpop.permute.xlu2 %31  }
  0x65   :  { %v38_v9 = vpop.permute.xlu2 %37  }
  0x74   :  { %v8_v10 = vpop.permute.xlu0 %7   ;;  %v20_v11 = vpop.permute.xlu1 %19  }
  0x75   :  { %10 = vst.msk [vmem:[#allocation0] sm:$0x1] %vm9_vm1, %v8_v10  }
  0x7c   :  { %v14_v12 = vpop.permute.xlu0 %13   ;;  %v26_v13 = vpop.permute.xlu1 %25  }
  0x7d   :  { %16 = vst.msk [vmem:[#allocation0] sm:$0x1] %vm15_vm2, %v14_v12  }
  0x7e   :  { %22 = vst.msk [vmem:[#allocation0] sm:$0x1] %vm21_vm3, %v20_v11  }
  0x7f   :  { %28 = vst.msk [vmem:[#allocation0] sm:$0x1] %vm27_vm4, %v26_v13  }
  0x80   :  { %34 = vst.msk [vmem:[#allocation0] sm:$0x1] %vm33_vm5, %v32_v8  }
  0x81   :  { %40 = vst.msk [vmem:[#allocation0] sm:$0x1] %vm39_vm6, %v38_v9  }
  0x84   :  { %v44_v14 = vpop.permute.xlu0 %43  }
  0x85   :  { %46 = vst.msk [vmem:[#allocation0] sm:$0x1] %vm45_vm7, %v44_v14  }
  0x8c   :  { %v49_v15 = vld [vmem:[#allocation0] sm:$0x1] }
  0x8d   :  { %52 = vst [vmem:[%s112_s1] sm:$0x1] %v49_v15 }

// kernel: detector_forward.1
= control target key start
LH: loop header
LB: loop body
LE: loop exit
PB: predicated region body
PF: predicated region fallthrough
CT: control target
= control target key end

     0   :  { %s706_s24 = smov 0   ;;  %s823_s0 = inlined_call_operand.vmem [shape: f32[2,128,256], index: 0, kind: input, shape index: {}]   ;;  %s824_s1 = inlined_call_operand.vmem [shape: f32[32,128], index: 1, kind: input, shape index: {}]   ;;  %s825_s2 = inlined_call_operand.vmem [shape: f32[32,1], index: 2, kind: input, shape index: {}]   ;;  %s826_s3 = inlined_call_operand.vmem [shape: f32[2,4,128], index: 3, kind: input, shape index: {}]   ;;  %s827_s4 = inlined_call_operand.vmem [shape: f32[1,128], index: 4, kind: input, shape index: {}]   ;;  %s828_s5 = inlined_call_operand.vmem [shape: f32[2,32,256], index: 5, kind: output, shape index: {0}]   ;;  %s829_s6 = inlined_call_operand.vmem [shape: f32[2,5,128], index: 6, kind: output, shape index: {1}]   ;;  %s830_s7 = inlined_call_operand.vmem [shape: s32[2,1,128], index: 7, kind: output, shape index: {2}]  }
   0x1 LB: > { %s597_s25 = sadd.s32 4294967295, %s663_s24   ;;  %p601_p0 = scmp.ge.s32.totalorder %s663_s24, 1  ;;  %s663_s24 = sphi %s706_s24, %s18_s24  }
   0x2   : > { %p251_p1 = scmp.lt.s32.totalorder %s663_s24, 3 }
   0x4   : > { %p252_p2 = pnand %p601_p0, %p251_p1 }
   0x5   : > { %p294_p3 = scmp.lt.s32.totalorder (!%p252_p2), %s597_s25, 1  ;;  %s454_s28 = scvt.s32.f32 (!%p252_p2), %s597_s25 }
   0x6   : > { %255 = sbr.rel (%p252_p2) target bundleno = 192 (0xc0), region = 40 }
   0xb   : > { %s714_s26 = scalar_select %p294_p3, %s597_s25, 1  ;;  %v455_v5 = vstv %s454_s28  ;;  %v441_v15 = vld [vmem:[%s827_s4] sm:$0x1]  ;;  %v317_v51 = vld [vmem:[%s824_s1 + $0x10] sm:$0xff]  ;;  %v665_v52 = vmov 0   ;;  %v316_v56 = vld [vmem:[%s824_s1 + $0x8] sm:$0xff] }
   0xc   : > { %v753_v17 = vmul.f32 320.0, %v441_v15  ;;  %v315_v50 = vld [vmem:[%s824_s1] sm:$0xff]  ;;  %v353_v54 = vld [vmem:[%s825_s2 + $0x10] sm:$0xff]  ;;  %656 = vset.pattern.permute.xlu1 %v665_v52  ;;  %655 = vset.pattern.permute.xlu0 %v665_v52  ;;  %v318_v57 = vld [vmem:[%s824_s1 + $0x18] sm:$0xff] }
   0xd   : > { %s612_s27 = sshll.u32 %s714_s26, 8  ;;  %s607_s9 = sshll.u32 %s714_s26, 3  ;;  %v351_v55 = vld [vmem:[%s825_s2] sm:$0xff]  ;;  %367 = vperm.xlu1 %656, %v353_v54   ;;  %v354_v58 = vld [vmem:[%s825_s2 + $0x18] sm:$0xff]  ;;  %v352_v59 = vld [vmem:[%s825_s2 + $0x8] sm:$0xff] }
   0xe   : > { %s720_s8 = scalar_lea.vmem %s823_s0, %s612_s27  ;;  %s730_s12 = scalar_lea.vmem %s829_s6, %s607_s9  ;;  %v609_v21 = vadd.f32 -4.0, %v753_v17  ;;  %v463_v22 = vadd.f32 4.0, %v753_v17  ;;  %vm468_vm0 = vcmp.ge.f32.partialorder %v753_v17, 0.0  ;;  %vm470_vm1 = vcmp.lt.f32.partialorder %v753_v17, 320.0  ;;  %357 = vperm.xlu0 %655, %v351_v55  }
   0xf   : > { %v349_v0 = vld [vmem:[%s720_s8 + $0xf0] sm:$0xff]  ;;  %v350_v1 = vld [vmem:[%s720_s8 + $0xf8] sm:$0xff]  ;;  %v347_v2 = vld [vmem:[%s720_s8 + $0xe0] sm:$0xff]  ;;  %456 = vst [vmem:[%s730_s12] sm:$0x1] %v455_v5  ;;  %s604_s13 = sshll.u32 %s714_s26, 2  ;;  %s314_s27 = scalar_lea.vmem %s830_s7, %s714_s26 }
  0x10   : > { %375 = vmatpush.msra.mxu0 %v349_v0  ;;  %614 = vmatpush.msra.mxu2 %v349_v0  ;;  %v348_v3 = vld [vmem:[%s720_s8 + $0xe8] sm:$0xff]  ;;  %v345_v4 = vld [vmem:[%s720_s8 + $0xd0] sm:$0xff]  ;;  %v346_v6 = vld [vmem:[%s720_s8 + $0xd8] sm:$0xff]  ;;  %s746_s16 = scalar_lea.vmem %s826_s3, %s604_s13  ;;  %460 = vst [vmem:[%s730_s12 + $0x2] sm:$0x1] %v609_v21  ;;  %s613_s17 = sshll.u32 %s714_s26, 6 }
  0x11   : > { %404 = vmatpush.msra.mxu1 %v350_v1  ;;  %630 = vmatpush.msra.mxu3 %v350_v1  ;;  %v343_v7 = vld [vmem:[%s720_s8 + $0xc0] sm:$0xff]  ;;  %v344_v8 = vld [vmem:[%s720_s8 + $0xc8] sm:$0xff]  ;;  %v341_v9 = vld [vmem:[%s720_s8 + $0xb0] sm:$0xff]  ;;  %464 = vst [vmem:[%s730_s12 + $0x4] sm:$0x1] %v463_v22  ;;  %s307_s20 = scalar_lea.vmem %s828_s5, %s613_s17 }
  0x12   : > { %376 = vmatpush.msra.mxu0 %v347_v2  ;;  %615 = vmatpush.msra.mxu2 %v347_v2  ;;  %v342_v10 = vld [vmem:[%s720_s8 + $0xb8] sm:$0xff]  ;;  %v339_v11 = vld [vmem:[%s720_s8 + $0xa0] sm:$0xff]  ;;  %v340_v12 = vld [vmem:[%s720_s8 + $0xa8] sm:$0xff] }
  0x13   : > { %405 = vmatpush.msra.mxu1 %v348_v3  ;;  %631 = vmatpush.msra.mxu3 %v348_v3  ;;  %v337_v13 = vld [vmem:[%s720_s8 + $0x90] sm:$0xff]  ;;  %v338_v14 = vld [vmem:[%s720_s8 + $0x98] sm:$0xff]  ;;  %v335_v16 = vld [vmem:[%s720_s8 + $0x80] sm:$0xff] }
  0x14   : > { %377 = vmatpush.msra.mxu0 %v345_v4  ;;  %616 = vmatpush.msra.mxu2 %v345_v4  ;;  %v336_v18 = vld [vmem:[%s720_s8 + $0x88] sm:$0xff]  ;;  %v445_v19 = vld [vmem:[%s746_s16 + $0x3] sm:$0x1]  ;;  %v333_v20 = vld [vmem:[%s720_s8 + $0x70] sm:$0xff] }
  0x15   : > { %406 = vmatpush.msra.mxu1 %v346_v6  ;;  %632 = vmatpush.msra.mxu3 %v346_v6  ;;  %v444_v23 = vld [vmem:[%s746_s16 + $0x2] sm:$0x1]  ;;  %v334_v24 = vld [vmem:[%s720_s8 + $0x78] sm:$0xff]  ;;  %v446_v25 = vmul.f32 %v445_v19, %v441_v15  ;;  %v332_v27 = vld [vmem:[%s720_s8 + $0x68] sm:$0xff] }
  0x16   : > { %378 = vmatpush.msra.mxu0 %v343_v7  ;;  %617 = vmatpush.msra.mxu2 %v343_v7  ;;  %v331_v26 = vld [vmem:[%s720_s8 + $0x60] sm:$0xff]  ;;  %v329_v29 = vld [vmem:[%s720_s8 + $0x50] sm:$0xff]  ;;  %v330_v31 = vld [vmem:[%s720_s8 + $0x58] sm:$0xff] }
  0x17   : > { %407 = vmatpush.msra.mxu1 %v344_v8  ;;  %633 = vmatpush.msra.mxu3 %v344_v8  ;;  %v447_v28 = vadd.f32 %v446_v25, %v444_v23  ;;  %v443_v30 = vld [vmem:[%s746_s16 + $0x1] sm:$0x1]  ;;  %v328_v34 = vld [vmem:[%s720_s8 + $0x48] sm:$0xff]  ;;  %v325_v36 = vld [vmem:[%s720_s8 + $0x30] sm:$0xff] }
  0x18   : > { %379 = vmatpush.msra.mxu0 %v341_v9  ;;  %618 = vmatpush.msra.mxu2 %v341_v9  ;;  %v327_v33 = vld [vmem:[%s720_s8 + $0x40] sm:$0xff]  ;;  %v326_v38 = vld [vmem:[%s720_s8 + $0x38] sm:$0xff]  ;;  %v324_v41 = vld [vmem:[%s720_s8 + $0x28] sm:$0xff] }
  0x19   : > { %408 = vmatpush.msra.mxu1 %v342_v10  ;;  %634 = vmatpush.msra.mxu3 %v342_v10  ;;  %v448_v32 = vmul.f32 %v447_v28, %v441_v15  ;;  %v442_v37 = vld [vmem:[%s746_s16] sm:$0x1]  ;;  %v321_v43 = vld [vmem:[%s720_s8 + $0x10] sm:$0xff]  ;;  %v322_v44 = vld [vmem:[%s720_s8 + $0x18] sm:$0xff] }
  0x1a   : > { %380 = vmatpush.msra.mxu0 %v339_v11  ;;  %619 = vmatpush.msra.mxu2 %v339_v11  ;;  %v323_v40 = vld [vmem:[%s720_s8 + $0x20] sm:$0xff]  ;;  %v320_v47 = vld [vmem:[%s720_s8 + $0x8] sm:$0xff] }
  0x1b   : > { %409 = vmatpush.msra.mxu1 %v340_v12  ;;  %635 = vmatpush.msra.mxu3 %v340_v12  ;;  %v449_v35 = vadd.f32 %v448_v32, %v443_v30  ;;  %v319_v46 = vld [vmem:[%s720_s8] sm:$0xff] }
  0x1c   : > { %381 = vmatpush.msra.mxu0 %v337_v13  ;;  %620 = vmatpush.msra.mxu2 %v337_v13 }
  0x1d   : > { %410 = vmatpush.msra.mxu1 %v338_v14  ;;  %636 = vmatpush.msra.mxu3 %v338_v14  ;;  %v450_v39 = vmul.f32 %v449_v35, %v441_v15 }
  0x1e   : > { %382 = vmatpush.msra.mxu0 %v335_v16  ;;  %621 = vmatpush.msra.mxu2 %v335_v16 }
  0x1f   : > { %411 = vmatpush.msra.mxu1 %v336_v18  ;;  %637 = vmatpush.msra.mxu3 %v336_v18  ;;  %v451_v42 = vadd.f32 %v450_v39, %v442_v37 }
  0x20   : > { %383 = vmatpush.msra.mxu0 %v333_v20  ;;  %622 = vmatpush.msra.mxu2 %v333_v20 }
  0x21   : > { %412 = vmatpush.msra.mxu1 %v334_v24  ;;  %638 = vmatpush.msra.mxu3 %v334_v24  ;;  %v452_v45 = vmul.f32 800.0, %v451_v42 }
  0x22   : > { %384 = vmatpush.msra.mxu0 %v331_v26  ;;  %623 = vmatpush.msra.mxu2 %v331_v26 }
  0x23   : > { %413 = vmatpush.msra.mxu1 %v332_v27  ;;  %639 = vmatpush.msra.mxu3 %v332_v27  ;;  %v608_v48 = vadd.f32 -4.0, %v452_v45  ;;  %v461_v49 = vadd.f32 4.0, %v452_v45  ;;  %vm465_vm2 = vcmp.gt.f32.partialorder %v452_v45, 0.0  ;;  %vm466_vm3 = vcmp.lt.f32.partialorder %v452_v45, 800.0 }
  0x24   : > { %385 = vmatpush.msra.mxu0 %v329_v29  ;;  %624 = vmatpush.msra.mxu2 %v329_v29  ;;  %vm467_vm4 = vmand %vm465_vm2, %vm466_vm3 }
  0x25   : > { %414 = vmatpush.msra.mxu1 %v330_v31  ;;  %640 = vmatpush.msra.mxu3 %v330_v31  ;;  %458 = vst [vmem:[%s730_s12 + $0x1] sm:$0x1] %v608_v48  ;;  %vm469_vm5 = vmand %vm467_vm4, %vm468_vm0 }
  0x26   : > { %386 = vmatpush.msra.mxu0 %v327_v33  ;;  %625 = vmatpush.msra.mxu2 %v327_v33  ;;  %462 = vst [vmem:[%s730_s12 + $0x3] sm:$0x1] %v461_v49  ;;  %vm471_vm6 = vmand %vm469_vm5, %vm470_vm1 }
  0x27   : > { %415 = vmatpush.msra.mxu1 %v328_v34  ;;  %641 = vmatpush.msra.mxu3 %v328_v34  ;;  %v472_v53 = vsel %vm471_vm6, 1, %v665_v52 }
  0x28   : > { %387 = vmatpush.msra.mxu0 %v325_v36  ;;  %626 = vmatpush.msra.mxu2 %v325_v36  ;;  %473 = vst [vmem:[%s314_s27] sm:$0x1] %v472_v53 }
  0x29   : > { %416 = vmatpush.msra.mxu1 %v326_v38  ;;  %642 = vmatpush.msra.mxu3 %v326_v38 }
  0x2a   : > { %388 = vmatpush.msra.mxu0 %v323_v40  ;;  %627 = vmatpush.msra.mxu2 %v323_v40 }
  0x2b   : > { %417 = vmatpush.msra.mxu1 %v324_v41  ;;  %643 = vmatpush.msra.mxu3 %v324_v41 }
  0x2c   : > { %389 = vmatpush.msra.mxu0 %v321_v43  ;;  %628 = vmatpush.msra.mxu2 %v321_v43 }
  0x2d   : > { %418 = vmatpush.msra.mxu1 %v322_v44  ;;  %644 = vmatpush.msra.mxu3 %v322_v44 }
  0x2e   : > { %390 = vmatpush.msra.mxu0 %v319_v46  ;;  %629 = vmatpush.msra.mxu2 %v319_v46 }
  0x2f   : > { %419 = vmatpush.msra.mxu1 %v320_v47  ;;  %645 = vmatpush.msra.mxu3 %v320_v47 }
  0x30   : > { %391 = vmatmul.f32.vlgmr.msra.gmra.mxu0 %v315_v50  ;;  %397 = vmatmul.f32.vlgmr.msra.gmra.mxu2 %v317_v51 }
  0x31   : > { %420 = vmatmul.f32.vlgmr.msra.gmra.mxu1 %v315_v50  ;;  %426 = vmatmul.f32.vlgmr.msra.gmra.mxu3 %v317_v51 }
  0x32   : > { %372 = vperm.xlu1 %656, %v354_v58   ;;  %362 = vperm.xlu0 %655, %v352_v59  }
  0x38   : > { %394 = vmatmul.f32.gmra.mxu0 %v316_v56  ;;  %400 = vmatmul.f32.gmra.mxu2 %v318_v57 }
  0x39   : > { %423 = vmatmul.f32.gmra.mxu1 %v316_v56  ;;  %429 = vmatmul.f32.gmra.mxu3 %v318_v57 }
  0x7f   : > { %v368_v1 = vpop.permute.xlu1 %367 }
  0x80   : > { %v358_v60 = vpop.permute.xlu0 %357 }
  0xa4   : > { %v363_v5 = vpop.permute.xlu0 %362  ;;  %v373_v11 = vpop.permute.xlu1 %372 }
  0xad   : > { %v392_v61 = vpop.f32.mrf.mxu0 }
  0xae   : > { %v393_v62 = vadd.f32 %v392_v61, %v358_v60  ;;  %v421_v63 = vpop.f32.mrf.mxu1 }
  0xaf   : > { %v422_v0 = vadd.f32 %v421_v63, %v358_v60 }
  0xb0   : > { %433 = vst [vmem:[%s307_s20] sm:$0xff] %v393_v62 }
  0xb1   : > { %434 = vst [vmem:[%s307_s20 + $0x8] sm:$0xff] %v422_v0 }
  0xb3   : > { %v398_v2 = vpop.f32.mrf.mxu2 }
  0xb4   : > { %v399_v3 = vadd.f32 %v398_v2, %v368_v1  ;;  %v427_v4 = vpop.f32.mrf.mxu3 }
  0xb5   : > { %v428_v6 = vadd.f32 %v427_v4, %v368_v1  ;;  %v395_v7 = vpop.f32.mrf.mxu0 }
  0xb6   : > { %437 = vst [vmem:[%s307_s20 + $0x20] sm:$0xff] %v399_v3  ;;  %v396_v8 = vadd.f32 %v395_v7, %v363_v5  ;;  %v424_v9 = vpop.f32.mrf.mxu1 }
  0xb7   : > { %438 = vst [vmem:[%s307_s20 + $0x28] sm:$0xff] %v428_v6  ;;  %v425_v10 = vadd.f32 %v424_v9, %v363_v5 }
  0xb8   : > { %435 = vst [vmem:[%s307_s20 + $0x10] sm:$0xff] %v396_v8 }
  0xb9   : > { %436 = vst [vmem:[%s307_s20 + $0x18] sm:$0xff] %v425_v10 }
  0xbb   : > { %v401_v12 = vpop.f32.mrf.mxu2 }
  0xbc   : > { %v402_v13 = vadd.f32 %v401_v12, %v373_v11  ;;  %v430_v14 = vpop.f32.mrf.mxu3 }
  0xbd   : > { %v431_v15 = vadd.f32 %v430_v14, %v373_v11 }
  0xbe   : > { %439 = vst [vmem:[%s307_s20 + $0x30] sm:$0xff] %v402_v13 }
  0xbf   : > { %440 = vst [vmem:[%s307_s20 + $0x38] sm:$0xff] %v431_v15 }
  0xc0 PF: > { %s18_s24 = sadd.s32 1, %s663_s24  }
  0xc1   : > { %p15_p4 = scmp.ge.s32.totalorder %s18_s24, 4  }
  0xc3   :  { %17 = sbr.rel (!%p15_p4) target bundleno = 1 (0x1), region = 97 }

</bundles_post_ra>
